<compile_context>
chip_gen: v6e
topology: v6e:2x2x1
jax: 0.10.0
libtpu: 0.0.40
codegen_flags: <defaults>
</compile_context>

<pallas_src>
import jax
import jax.numpy as jnp
from jax.experimental import pallas as pl
from jax.experimental.pallas import tpu as pltpu


def _round_up(x, m):
    return ((x + m - 1) // m) * m


def _ffnetwork_kernel(x_ref, w1_ref, b1_ref, w2_ref, b2_ref, w3_ref, b3_ref,
                      o_ref):
    # Three MXU matmuls on bf16 operands with f32 accumulation; bias add and
    # tanh run on the VPU/EUP in f32.
    x = x_ref[...]                                              # bf16 (TB, in_dim)
    h1 = jnp.tanh(
        jnp.dot(x, w1_ref[...], preferred_element_type=jnp.float32)
        + b1_ref[...])
    h2 = jnp.tanh(
        jnp.dot(h1.astype(jnp.bfloat16), w2_ref[...],
                preferred_element_type=jnp.float32)
        + b2_ref[...])
    out = (jnp.dot(h2.astype(jnp.bfloat16), w3_ref[...],
                   preferred_element_type=jnp.float32)
           + b3_ref[...])
    o_ref[...] = out.astype(o_ref.dtype)


def ffnetwork_forward(x, params, *, block_b=512):
    """Fused 3-layer MLP forward pass as a single batch-tiled pallas_call.

    x: (B, in_dim) or (in_dim,) float32
    params: dict with w1,b1,w2,b2,w3,b3 (weights in (fan_in, fan_out) layout,
            biases shaped (1, fan_out), all float32).
    """
    x = jnp.asarray(x, jnp.float32)
    if x.ndim == 1:                        # mirror torch `unsqueeze(0)` branch
        x = x[None, :]
    B, in_dim = x.shape

    w1, b1 = params["w1"], params["b1"]
    w2, b2 = params["w2"], params["b2"]
    w3, b3 = params["w3"], params["b3"]
    hidden = w1.shape[1]
    out_dim = w3.shape[1]

    # bf16 operands for the MXU; biases stay f32 (f32 accumulate + tanh).
    x_bf = x.astype(jnp.bfloat16)
    w1b = w1.astype(jnp.bfloat16)
    w2b = w2.astype(jnp.bfloat16)
    w3b = w3.astype(jnp.bfloat16)

    # Batch tile: multiple of 16 (bf16 sublane packing); pad B up to a
    # multiple of TB so every grid step sees a full tile. Padded rows are
    # zeros and get sliced off at the end (rows are independent).
    TB = block_b if B >= block_b else _round_up(B, 16)
    Bp = _round_up(B, TB)
    if Bp != B:
        x_bf = jnp.pad(x_bf, ((0, Bp - B), (0, 0)))

    grid = (Bp // TB,)

    def weight_spec(a):
        # Whole array, same block every grid step -> stays resident in VMEM.
        return pl.BlockSpec(a.shape, lambda i: (0,) * a.ndim)

    flops = 2 * Bp * (in_dim * hidden + hidden * hidden + hidden * out_dim)
    transcendentals = 2 * Bp * hidden
    bytes_accessed = (
        Bp * in_dim * 2                                   # x (bf16)
        + (w1b.size + w2b.size + w3b.size) * 2            # weights (bf16)
        + (b1.size + b2.size + b3.size) * 4               # biases (f32)
        + Bp * out_dim * 4)                               # output (f32)

    out = pl.pallas_call(
        _ffnetwork_kernel,
        out_shape=jax.ShapeDtypeStruct((Bp, out_dim), jnp.float32),
        grid=grid,
        in_specs=[
            pl.BlockSpec((TB, in_dim), lambda i: (i, 0)),
            weight_spec(w1b), weight_spec(b1),
            weight_spec(w2b), weight_spec(b2),
            weight_spec(w3b), weight_spec(b3),
        ],
        out_specs=pl.BlockSpec((TB, out_dim), lambda i: (i, 0)),
        compiler_params=pltpu.CompilerParams(
            dimension_semantics=("parallel",)),
        cost_estimate=pl.CostEstimate(
            flops=flops,
            transcendentals=transcendentals,
            bytes_accessed=bytes_accessed),
    )(x_bf, w1b, b1, w2b, b2, w3b, b3)

    return out[:B] if Bp != B else out


def init_ffnetwork_params(key, in_dim, out_dim, hidden=64):
    """Deterministic init matching nn.Linear's U(-1/sqrt(fan_in), 1/sqrt(fan_in))."""
    ks = jax.random.split(key, 6)

    def linear(kw, kb, fan_in, fan_out):
        bound = 1.0 / jnp.sqrt(float(fan_in))
        w = jax.random.uniform(kw, (fan_in, fan_out), jnp.float32,
                               -bound, bound)
        b = jax.random.uniform(kb, (1, fan_out), jnp.float32, -bound, bound)
        return w, b

    w1, b1 = linear(ks[0], ks[1], in_dim, hidden)
    w2, b2 = linear(ks[2], ks[3], hidden, hidden)
    w3, b3 = linear(ks[4], ks[5], hidden, out_dim)
    return {"w1": w1, "b1": b1, "w2": w2, "b2": b2, "w3": w3, "b3": b3}


def _reference_forward(x, p):
    # Reference uses the same bf16 operand / f32 accumulate recipe as the
    # kernel so the comparison is tight.
    x = jnp.asarray(x, jnp.float32)
    if x.ndim == 1:
        x = x[None, :]
    xb = x.astype(jnp.bfloat16)
    w1b = p["w1"].astype(jnp.bfloat16)
    w2b = p["w2"].astype(jnp.bfloat16)
    w3b = p["w3"].astype(jnp.bfloat16)
    h1 = jnp.tanh(jnp.dot(xb, w1b, preferred_element_type=jnp.float32)
                  + p["b1"])
    h2 = jnp.tanh(jnp.dot(h1.astype(jnp.bfloat16), w2b,
                          preferred_element_type=jnp.float32) + p["b2"])
    return (jnp.dot(h2.astype(jnp.bfloat16), w3b,
                    preferred_element_type=jnp.float32) + p["b3"])


if __name__ == "__main__":
    key = jax.random.PRNGKey(0)
    k_param, k_x = jax.random.split(key)

    in_dim, out_dim, batch = 8, 4, 8
    params = init_ffnetwork_params(k_param, in_dim, out_dim)
    x = jax.random.normal(k_x, (batch, in_dim), jnp.float32)

    out = jax.block_until_ready(ffnetwork_forward(x, params))
    ref = _reference_forward(x, params)
    assert out.shape == (batch, out_dim)
    assert jnp.allclose(out, ref, atol=1e-4, rtol=1e-4)

    # 1-D input path (unsqueeze branch in forward()).
    out1 = jax.block_until_ready(ffnetwork_forward(x[0], params))
    assert out1.shape == (1, out_dim)
    assert jnp.allclose(out1, ref[:1], atol=1e-4, rtol=1e-4)

    # Exercise a batch larger than one tile (ragged: pads 1000 -> 1024).
    xb = jax.random.normal(k_x, (1000, in_dim), jnp.float32)
    outb = jax.block_until_ready(ffnetwork_forward(xb, params))
    assert outb.shape == (1000, out_dim)
    assert jnp.allclose(outb, _reference_forward(xb, params),
                        atol=1e-4, rtol=1e-4)

    print("KERNEL_OK")
</pallas_src>

<mosaic_0001>
module attributes {stable_mosaic.version = 11 : i64} {
  func.func @_ffnetwork_kernel(%arg0: i32, %arg1: memref<16x8xbf16, #tpu.memory_space<vmem>>, %arg2: memref<8x64xbf16, #tpu.memory_space<vmem>>, %arg3: memref<1x64xf32, #tpu.memory_space<vmem>>, %arg4: memref<64x64xbf16, #tpu.memory_space<vmem>>, %arg5: memref<1x64xf32, #tpu.memory_space<vmem>>, %arg6: memref<64x4xbf16, #tpu.memory_space<vmem>>, %arg7: memref<1x4xf32, #tpu.memory_space<vmem>>, %arg8: memref<16x4xf32, #tpu.memory_space<vmem>>) attributes {dimension_semantics = [#tpu.dimension_semantics<parallel>], iteration_bounds = array<i64: 1>, scalar_prefetch = 0 : i64, scratch_operands = 0 : i64, tpu.core_type = #tpu.core_type<tc>, window_params = [{transform_indices = @transform_0, window_bounds = array<i64: 16, 8>}, {pipeline_mode = #tpu.pipeline_mode<synchronous>, transform_indices = @transform_1, window_bounds = array<i64: 8, 64>}, {pipeline_mode = #tpu.pipeline_mode<synchronous>, transform_indices = @transform_2, window_bounds = array<i64: 1, 64>}, {pipeline_mode = #tpu.pipeline_mode<synchronous>, transform_indices = @transform_3, window_bounds = array<i64: 64, 64>}, {pipeline_mode = #tpu.pipeline_mode<synchronous>, transform_indices = @transform_4, window_bounds = array<i64: 1, 64>}, {pipeline_mode = #tpu.pipeline_mode<synchronous>, transform_indices = @transform_5, window_bounds = array<i64: 64, 4>}, {pipeline_mode = #tpu.pipeline_mode<synchronous>, transform_indices = @transform_6, window_bounds = array<i64: 1, 4>}, {transform_indices = @transform_7, window_bounds = array<i64: 16, 4>}]} {
    %c0 = arith.constant 0 : index
    %c0_0 = arith.constant 0 : index
    %0 = vector.load %arg1[%c0, %c0_0] : memref<16x8xbf16, #tpu.memory_space<vmem>>, vector<16x8xbf16>
    %c0_1 = arith.constant 0 : index
    %c0_2 = arith.constant 0 : index
    %1 = vector.load %arg2[%c0_1, %c0_2] : memref<8x64xbf16, #tpu.memory_space<vmem>>, vector<8x64xbf16>
    %cst = arith.constant dense<0.000000e+00> : vector<16x64xf32>
    %2 = tpu.matmul %0, %1, %cst {dimension_numbers = #tpu.dot_dimension_numbers<[1], [0], [0], [1], [0, 0, 1, 1], [], []>} : vector<16x8xbf16>, vector<8x64xbf16>, vector<16x64xf32> -> vector<16x64xf32>
    %c0_3 = arith.constant 0 : index
    %c0_4 = arith.constant 0 : index
    %3 = vector.load %arg3[%c0_3, %c0_4] : memref<1x64xf32, #tpu.memory_space<vmem>>, vector<1x64xf32>
    %4 = vector.broadcast %3 : vector<1x64xf32> to vector<16x64xf32>
    %5 = arith.addf %2, %4 : vector<16x64xf32>
    %6 = math.tanh %5 : vector<16x64xf32>
    %7 = arith.truncf %6 : vector<16x64xf32> to vector<16x64xbf16>
    %c0_5 = arith.constant 0 : index
    %c0_6 = arith.constant 0 : index
    %8 = vector.load %arg4[%c0_5, %c0_6] : memref<64x64xbf16, #tpu.memory_space<vmem>>, vector<64x64xbf16>
    %cst_7 = arith.constant dense<0.000000e+00> : vector<16x64xf32>
    %9 = tpu.matmul %7, %8, %cst_7 {dimension_numbers = #tpu.dot_dimension_numbers<[1], [0], [0], [1], [0, 0, 1, 1], [], []>} : vector<16x64xbf16>, vector<64x64xbf16>, vector<16x64xf32> -> vector<16x64xf32>
    %c0_8 = arith.constant 0 : index
    %c0_9 = arith.constant 0 : index
    %10 = vector.load %arg5[%c0_8, %c0_9] : memref<1x64xf32, #tpu.memory_space<vmem>>, vector<1x64xf32>
    %11 = vector.broadcast %10 : vector<1x64xf32> to vector<16x64xf32>
    %12 = arith.addf %9, %11 : vector<16x64xf32>
    %13 = math.tanh %12 : vector<16x64xf32>
    %14 = arith.truncf %13 : vector<16x64xf32> to vector<16x64xbf16>
    %c0_10 = arith.constant 0 : index
    %c0_11 = arith.constant 0 : index
    %15 = vector.load %arg6[%c0_10, %c0_11] : memref<64x4xbf16, #tpu.memory_space<vmem>>, vector<64x4xbf16>
    %cst_12 = arith.constant dense<0.000000e+00> : vector<16x4xf32>
    %16 = tpu.matmul %14, %15, %cst_12 {dimension_numbers = #tpu.dot_dimension_numbers<[1], [0], [0], [1], [0, 0, 1, 1], [], []>} : vector<16x64xbf16>, vector<64x4xbf16>, vector<16x4xf32> -> vector<16x4xf32>
    %c0_13 = arith.constant 0 : index
    %c0_14 = arith.constant 0 : index
    %17 = vector.load %arg7[%c0_13, %c0_14] : memref<1x4xf32, #tpu.memory_space<vmem>>, vector<1x4xf32>
    %18 = vector.broadcast %17 : vector<1x4xf32> to vector<16x4xf32>
    %19 = arith.addf %16, %18 : vector<16x4xf32>
    %c0_15 = arith.constant 0 : index
    %c0_16 = arith.constant 0 : index
    %20 = vector.load %arg8[%c0_15, %c0_16] : memref<16x4xf32, #tpu.memory_space<vmem>>, vector<16x4xf32>
    tpu.vector_store %arg8[%c0_15, %c0_16], %19 {strides = array<i32>} : memref<16x4xf32, #tpu.memory_space<vmem>>, vector<16x4xf32>,
    return
  }
  func.func @transform_0(%arg0: i32) -> (i32, i32) {
    %c0_i32 = arith.constant 0 : i32
    %c0_i32_0 = arith.constant 0 : i32
    return %arg0, %c0_i32 : i32, i32
  }
  func.func @transform_1(%arg0: i32) -> (i32, i32) {
    %c0_i32 = arith.constant 0 : i32
    %c0_i32_0 = arith.constant 0 : i32
    %c0_i32_1 = arith.constant 0 : i32
    return %c0_i32, %c0_i32_0 : i32, i32
  }
  func.func @transform_2(%arg0: i32) -> (i32, i32) {
    %c0_i32 = arith.constant 0 : i32
    %c0_i32_0 = arith.constant 0 : i32
    %c0_i32_1 = arith.constant 0 : i32
    return %c0_i32, %c0_i32_0 : i32, i32
  }
  func.func @transform_3(%arg0: i32) -> (i32, i32) {
    %c0_i32 = arith.constant 0 : i32
    %c0_i32_0 = arith.constant 0 : i32
    %c0_i32_1 = arith.constant 0 : i32
    return %c0_i32, %c0_i32_0 : i32, i32
  }
  func.func @transform_4(%arg0: i32) -> (i32, i32) {
    %c0_i32 = arith.constant 0 : i32
    %c0_i32_0 = arith.constant 0 : i32
    %c0_i32_1 = arith.constant 0 : i32
    return %c0_i32, %c0_i32_0 : i32, i32
  }
  func.func @transform_5(%arg0: i32) -> (i32, i32) {
    %c0_i32 = arith.constant 0 : i32
    %c0_i32_0 = arith.constant 0 : i32
    %c0_i32_1 = arith.constant 0 : i32
    return %c0_i32, %c0_i32_0 : i32, i32
  }
  func.func @transform_6(%arg0: i32) -> (i32, i32) {
    %c0_i32 = arith.constant 0 : i32
    %c0_i32_0 = arith.constant 0 : i32
    %c0_i32_1 = arith.constant 0 : i32
    return %c0_i32, %c0_i32_0 : i32, i32
  }
  func.func @transform_7(%arg0: i32) -> (i32, i32) {
    %c0_i32 = arith.constant 0 : i32
    %c0_i32_0 = arith.constant 0 : i32
    return %arg0, %c0_i32 : i32, i32
  }
}

</mosaic_0001>

<bundles_post_ra>
// kernel: tpu_custom_call.1
= control target key start
LH: loop header
LB: loop body
LE: loop exit
PB: predicated region body
PF: predicated region fallthrough
CT: control target
= control target key end

     0   :  { %vm46_vm0 = vcmask 1043456   ;;  %v347_v0 = vmov 0.0   ;;  %vm348_vm1 = vmmov 0   ;;  %vm42_vm2 = vcmask 64512   ;;  %s436_s1 = inlined_call_operand.vmem [shape: bf16[8,64], index: 1, kind: input, shape index: {}]   ;;  %s437_s0 = inlined_call_operand.vmem [shape: bf16[16,8], index: 0, kind: input, shape index: {}]   ;;  %s438_s3 = inlined_call_operand.vmem [shape: bf16[64,64], index: 3, kind: input, shape index: {}]   ;;  %s439_s2 = inlined_call_operand.vmem [shape: f32[1,64], index: 2, kind: input, shape index: {}]   ;;  %s440_s5 = inlined_call_operand.vmem [shape: bf16[64,4], index: 5, kind: input, shape index: {}]   ;;  %s441_s4 = inlined_call_operand.vmem [shape: f32[1,64], index: 4, kind: input, shape index: {}]   ;;  %s442_s6 = inlined_call_operand.vmem [shape: f32[1,4], index: 6, kind: input, shape index: {}]   ;;  %s443_s7 = inlined_call_operand.vmem [shape: f32[16,4], index: 7, kind: output, shape index: {}]  }
   0x1   :  { %298 = vmatprep.subr.bf16.mxu0 %v347_v0  ;;  %v29_v1 = vld [vmem:[%s436_s1] sm:$0xf]  ;;  %300 = vmatprep.mubr.msk.bf16.mxu0 %vm348_vm1, %v347_v0  ;;  %v331_v4 = vld [vmem:[%s438_s3 + $0x18] sm:$0xff]   ;;  %v332_v5 = vld [vmem:[%s438_s3 + $0x10] sm:$0xff]   ;;  %vm133_vm3 = vcmask 523264   ;;  %vm264_vm4 = vcmask 31744  }
   0x2   :  { %v48_v2 = vsel %vm46_vm0, %v29_v1, 0  ;;  %v330_v3 = vld [vmem:[%s437_s0] sm:$0xff]   ;;  %304 = vmatprep.subr.bf16.mxu1 %v347_v0  ;;  %312 = vmatprep.mubr.msk.bf16.mxu1 %vm348_vm1, %v347_v0  ;;  %v333_v6 = vld [vmem:[%s438_s3 + $0x8] sm:$0xff]   ;;  %v335_v18 = vld [vmem:[%s440_s5 + $0x18] sm:$0xff]  }
   0x3   :  { %299 = vmatpush3.bf16.msra.mxu0 %v48_v2  ;;  %305 = vmatpush3.bf16.msra.mxu1 %v331_v4  ;;  %v334_v7 = vld [vmem:[%s438_s3] sm:$0xff]   ;;  %v336_v19 = vld [vmem:[%s440_s5 + $0x10] sm:$0xff]   ;;  %v337_v20 = vld [vmem:[%s440_s5 + $0x8] sm:$0xff]  }
   0x4   :  { %316 = vmatprep.subr.bf16.mxu0 %v347_v0  ;;  %306 = vmatprep.subr.bf16.mxu1 %v347_v0  ;;  %v271_v8 = vld [vmem:[%s439_s2] ss:$0 sm:$0xff] }
   0x5   :  { %v338_v21 = vld [vmem:[%s440_s5] sm:$0xff]  }
   0x6   :  { %301 = vmatmul.mubr.msk.bf16.vlgmr.msra.gmra.mxu0 %vm42_vm2, %v330_v3  ;;  %v274_v22 = vld [vmem:[%s441_s4] ss:$0 sm:$0xff] }
   0x7   :  { %324 = vmatprep.mubr.msk.bf16.mxu0 %vm348_vm1, %v347_v0  ;;  %307 = vmatpush3.bf16.msra.mxu1 %v332_v5  ;;  %v280_v32 = vld [vmem:[%s442_s6] ss:$0 sm:$0xff] }
   0x8   :  { %308 = vmatprep.subr.bf16.mxu1 %v347_v0  ;;  %317 = vmatpush3.bf16.msra.mxu0 %v335_v18 }
   0x9   :  { %318 = vmatprep.subr.bf16.mxu0 %v347_v0 }
   0xb   :  { %309 = vmatpush3.bf16.msra.mxu1 %v333_v6 }
   0xc   :  { %310 = vmatprep.subr.bf16.mxu1 %v347_v0  ;;  %319 = vmatpush3.bf16.msra.mxu0 %v336_v19 }
   0xd   :  { %320 = vmatprep.subr.bf16.mxu0 %v347_v0 }
   0xf   :  { %311 = vmatpush3.bf16.msra.mxu1 %v334_v7 }
  0x10   :  { %321 = vmatpush3.bf16.msra.mxu0 %v337_v20 }
  0x11   :  { %322 = vmatprep.subr.bf16.mxu0 %v347_v0 }
  0x14   :  { %323 = vmatpush3.bf16.msra.mxu0 %v338_v21 }
  0xc6   :  { %v84_v9 = vpop.f32.mrf.mxu0 }
  0xc7   :  { %v85_v10 = vadd.f32 %v271_v8, %v84_v9 }
  0xc8   :  { %v302_v11 = vpop.f32.mrf.mxu0 }
  0xc9   :  { %339 = vtanh.f32 %v85_v10 }
  0xca   :  { %v87_v12 = vpop.f32.mrf.mxu0 }
  0xcb   :  { %v88_v13 = vadd.f32 %v271_v8, %v87_v12 }
  0xcc   :  { %v303_v14 = vpop.f32.mrf.mxu0 }
  0xcd   :  { %341 = vtanh.f32 %v88_v13 }
  0xd6   :  { %v340_v15 = vpop.eup %339 }
  0xda   :  { %v342_v16 = vpop.eup %341 }
  0xdb   :  { %v93_v17 = vpack.c.bf16 %v342_v16, %v340_v15 }
  0xdd   :  { %313 = vmatmul.mubr.msk.bf16.vlgmr.msra.gmra.mxu1 %vm133_vm3, %v93_v17 }
 0x19d   :  { %v171_v23 = vpop.f32.mrf.mxu1 }
 0x19e   :  { %v172_v24 = vadd.f32 %v274_v22, %v171_v23 }
 0x19f   :  { %v314_v25 = vpop.f32.mrf.mxu1 }
 0x1a0   :  { %343 = vtanh.f32 %v172_v24 }
 0x1a1   :  { %v174_v26 = vpop.f32.mrf.mxu1 }
 0x1a2   :  { %v175_v27 = vadd.f32 %v274_v22, %v174_v26 }
 0x1a3   :  { %v315_v28 = vpop.f32.mrf.mxu1 }
 0x1a4   :  { %345 = vtanh.f32 %v175_v27 }
 0x1ad   :  { %v344_v29 = vpop.eup %343 }
 0x1b1   :  { %v346_v30 = vpop.eup %345 }
 0x1b2   :  { %v180_v31 = vpack.c.bf16 %v346_v30, %v344_v29 }
 0x1b4   :  { %325 = vmatmul.mubr.msk.bf16.vlgmr.msra.gmra.mxu0 %vm133_vm3, %v180_v31 }
 0x274   :  { %v257_v33 = vpop.f32.mrf.mxu0 }
 0x275   :  { %v258_v34 = vadd.f32 %v280_v32, %v257_v33 }
 0x276   :  { %v326_v35 = vpop.f32.mrf.mxu0 }
 0x277   :  { %265 = vst.msk [vmem:[%s443_s7] sm:$0xff] %vm264_vm4, %v258_v34 }
 0x278   :  { %v260_v36 = vpop.f32.mrf.mxu0 }
 0x279   :  { %v261_v37 = vadd.f32 %v280_v32, %v260_v36 }
 0x27a   :  { %v327_v38 = vpop.f32.mrf.mxu0 }
 0x27b   :  { %266 = vst.msk [vmem:[%s443_s7 + $0x8] sm:$0xff] %vm264_vm4, %v261_v37 }

</bundles_post_ra>
